<compile_context>
chip_gen: v7x
topology: tpu7x:2x2x1
jax: 0.10.0
libtpu: 0.0.40
codegen_flags: <defaults>
</compile_context>

<pallas_src>
import functools

import jax
import jax.numpy as jnp
from jax import lax
from jax.experimental import pallas as pl
from jax.experimental.pallas import tpu as pltpu


def _round_up(x, m):
    return (x + m - 1) // m * m


def _cdiv(a, b):
    return -(-a // b)


def _head_transform_kernel(x_ref, w_ref, p_ref, o_ref, *, eps, h_real,
                           cast_dtype, approx_gelu, precision):
    x = x_ref[...]
    if cast_dtype is not None and x.dtype != cast_dtype:
        x = x.astype(cast_dtype)

    # Dense: native-dtype operands to the MXU, f32 accumulation.
    h = jnp.dot(x, w_ref[...], preferred_element_type=jnp.float32,
                precision=precision)
    h = h + p_ref[0:1, :]                      # bias (params already f32)

    if approx_gelu:
        # tanh approximation: transcendental goes to the EUP slot.
        c = jnp.float32(0.7978845608028654)    # sqrt(2/pi)
        h = 0.5 * h * (1.0 + jnp.tanh(c * (h + jnp.float32(0.044715) * h * h * h)))
    else:
        # Exact erf-based GELU (matches torch.nn.functional.gelu / HF "gelu").
        h = 0.5 * h * (1.0 + lax.erf(h * jnp.float32(0.7071067811865476)))

    # LayerNorm over the hidden (lane) axis.  If H was padded up to a multiple
    # of 128, mask the padded lanes out of the statistics.
    h_pad = h.shape[-1]
    if h_real != h_pad:
        lane = lax.broadcasted_iota(jnp.int32, h.shape, dimension=1)
        mask = lane < h_real
        inv_n = jnp.float32(1.0 / h_real)
        h = jnp.where(mask, h, 0.0)
        mean = jnp.sum(h, axis=-1, keepdims=True) * inv_n
        centered = jnp.where(mask, h - mean, 0.0)
        var = jnp.sum(centered * centered, axis=-1, keepdims=True) * inv_n
    else:
        mean = jnp.mean(h, axis=-1, keepdims=True)
        centered = h - mean
        var = jnp.mean(centered * centered, axis=-1, keepdims=True)

    normed = centered * lax.rsqrt(var + jnp.float32(eps))
    out = normed * p_ref[1:2, :] + p_ref[2:3, :]

    o_ref[...] = out.astype(o_ref.dtype)


def tabformer_bert_head_transform(x, w, b, gamma, beta, *, eps=1e-12, tm=1024,
                                  out_dtype=None, matmul_dtype=None,
                                  approximate_gelu=False, precision=None):
    """x: [B, S, F]; w: [F, H]; b/gamma/beta: [H]. Returns [B, S, H].

    out_dtype:      output dtype (default x.dtype; pass jnp.bfloat16 to halve
                    output HBM writeback when the consumer accepts it).
    matmul_dtype:   optional MXU operand dtype (e.g. jnp.bfloat16) -- numerics
                    trade-off vs. strict f32 parity.
    approximate_gelu: tanh GELU (EUP) instead of exact erf GELU (VALU).
    """
    B, S, F = x.shape
    H = w.shape[1]
    M = B * S
    out_dtype = x.dtype if out_dtype is None else jnp.dtype(out_dtype)

    x2 = x.reshape(M, F)

    # Lane-dense hidden axis: pad weight / params columns up to a multiple of
    # 128 (tiny one-off copy of the small weight; LN stats are masked).
    H_pad = _round_up(H, 128)
    if matmul_dtype is not None:
        w = w.astype(matmul_dtype)
    params = jnp.stack(
        [b.astype(jnp.float32), gamma.astype(jnp.float32), beta.astype(jnp.float32)],
        axis=0,
    )
    if H_pad != H:
        w = jnp.pad(w, ((0, 0), (0, H_pad - H)))
        params = jnp.pad(params, ((0, 0), (0, H_pad - H)))

    # ---- Row tile selection -------------------------------------------------
    tm = max(8, min(int(tm), _round_up(M, 8)))
    # Give the v7x megacore at least two tiles when there is enough work; the
    # extra grid step is ~0.35us, negligible on single-TC v5e/v6e.
    if _round_up(M, 8) >= 16:
        tm = max(8, min(tm, _round_up(_cdiv(M, 2), 8)))

    # ---- VMEM guard (matters on v7x: 64 MiB physical / 32 MiB default scoped)
    x_bytes = x2.dtype.itemsize
    w_bytes = w.dtype.itemsize
    out_bytes = out_dtype.itemsize

    def _vmem_estimate(t):
        return (2 * t * F * x_bytes            # double-buffered activation tile
                + 2 * F * H_pad * w_bytes      # resident weight
                + 2 * 3 * H_pad * 4            # fused bias/gamma/beta
                + 2 * t * H_pad * out_bytes    # double-buffered output tile
                + t * H_pad * 4)               # f32 intermediate

    try:
        vmem_cap = int(pltpu.get_tpu_info().vmem_capacity_bytes)
    except Exception:
        vmem_cap = 64 * 1024 * 1024            # assume the smallest (v7x per-TC)
    budget = int(vmem_cap * 0.6)               # headroom for compiler scratch
    while tm > 8 and _vmem_estimate(tm) > budget:
        tm = max(8, _round_up(tm // 2, 8))

    vmem_limit = None
    default_scoped = 32 * 1024 * 1024
    est = _vmem_estimate(tm)
    if est > default_scoped:
        vmem_limit = min(vmem_cap, int(est * 1.5))

    n_tiles = _cdiv(M, tm)

    kernel = functools.partial(
        _head_transform_kernel,
        eps=float(eps),
        h_real=H,
        cast_dtype=None if matmul_dtype is None else jnp.dtype(matmul_dtype),
        approx_gelu=bool(approximate_gelu),
        precision=precision,
    )

    cp_kwargs = dict(dimension_semantics=("parallel",))
    if vmem_limit is not None:
        cp_kwargs["vmem_limit_bytes"] = int(vmem_limit)

    out2 = pl.pallas_call(
        kernel,
        out_shape=jax.ShapeDtypeStruct((M, H_pad), out_dtype),
        grid_spec=pltpu.PrefetchScalarGridSpec(
            num_scalar_prefetch=0,
            grid=(n_tiles,),
            in_specs=[
                pl.BlockSpec((tm, F), lambda i: (i, 0)),      # activation row tile
                pl.BlockSpec((F, H_pad), lambda i: (0, 0)),   # dense weight (resident)
                pl.BlockSpec((3, H_pad), lambda i: (0, 0)),   # fused bias/gamma/beta
            ],
            out_specs=pl.BlockSpec((tm, H_pad), lambda i: (i, 0)),
        ),
        compiler_params=pltpu.CompilerParams(**cp_kwargs),
    )(x2, w, params)

    if H_pad != H:
        out2 = out2[:, :H]
    return out2.reshape(B, S, H)


def _reference(x, w, b, gamma, beta, eps):
    h = jnp.einsum("bsf,fh->bsh", x, w) + b
    h = 0.5 * h * (1.0 + lax.erf(h / jnp.sqrt(2.0)))
    mu = jnp.mean(h, axis=-1, keepdims=True)
    va = jnp.mean((h - mu) ** 2, axis=-1, keepdims=True)
    return (h - mu) / jnp.sqrt(va + eps) * gamma + beta


if __name__ == "__main__":
    EPS = 1e-12

    # Case 1: lane-dense hidden size (H multiple of 128).
    B, S, FIELD_HIDDEN, HIDDEN = 2, 8, 16, 128
    key = jax.random.PRNGKey(0)
    kx, kw, kb, kg, kbe, kx2, kw2, kb2, kg2, kbe2 = jax.random.split(key, 10)

    x = jax.random.normal(kx, (B, S, FIELD_HIDDEN), dtype=jnp.float32)
    w = jax.random.normal(kw, (FIELD_HIDDEN, HIDDEN), dtype=jnp.float32) * 0.02
    b = jax.random.normal(kb, (HIDDEN,), dtype=jnp.float32) * 0.02
    gamma = jnp.ones((HIDDEN,), dtype=jnp.float32) + 0.1 * jax.random.normal(
        kg, (HIDDEN,), dtype=jnp.float32
    )
    beta = 0.1 * jax.random.normal(kbe, (HIDDEN,), dtype=jnp.float32)

    out = tabformer_bert_head_transform(x, w, b, gamma, beta, eps=EPS)
    out = jax.block_until_ready(out)
    ref = _reference(x, w, b, gamma, beta, EPS)
    assert out.shape == (B, S, HIDDEN)
    assert jnp.allclose(out, ref, atol=1e-5, rtol=1e-5), "mismatch vs reference (case 1)"

    # Case 2: token count not a multiple of the row tile (ragged last block,
    # handled by Pallas masked stores -- no wrapper-side padding copy).
    B2, S2 = 3, 37
    x_odd = jax.random.normal(kx2, (B2, S2, FIELD_HIDDEN), dtype=jnp.float32)
    out_odd = tabformer_bert_head_transform(x_odd, w, b, gamma, beta, eps=EPS)
    out_odd = jax.block_until_ready(out_odd)
    ref_odd = _reference(x_odd, w, b, gamma, beta, EPS)
    assert out_odd.shape == (B2, S2, HIDDEN)
    assert jnp.allclose(out_odd, ref_odd, atol=1e-5, rtol=1e-5), "mismatch vs reference (case 2)"

    # Case 3: hidden size not a multiple of 128 (exercises lane-padding + masked
    # LayerNorm statistics).
    HIDDEN3 = 64
    w3 = jax.random.normal(kw2, (FIELD_HIDDEN, HIDDEN3), dtype=jnp.float32) * 0.02
    b3 = jax.random.normal(kb2, (HIDDEN3,), dtype=jnp.float32) * 0.02
    g3 = jnp.ones((HIDDEN3,), dtype=jnp.float32) + 0.1 * jax.random.normal(
        kg2, (HIDDEN3,), dtype=jnp.float32
    )
    be3 = 0.1 * jax.random.normal(kbe2, (HIDDEN3,), dtype=jnp.float32)
    out3 = tabformer_bert_head_transform(x, w3, b3, g3, be3, eps=EPS)
    out3 = jax.block_until_ready(out3)
    ref3 = _reference(x, w3, b3, g3, be3, EPS)
    assert out3.shape == (B, S, HIDDEN3)
    assert jnp.allclose(out3, ref3, atol=1e-5, rtol=1e-5), "mismatch vs reference (case 3)"

    print("KERNEL_OK")
</pallas_src>

<mosaic_0001>
module attributes {stable_mosaic.version = 11 : i64} {
  func.func @_head_transform_kernel(%arg0: i32, %arg1: memref<8x16xf32, #tpu.memory_space<vmem>>, %arg2: memref<16x128xf32, #tpu.memory_space<vmem>>, %arg3: memref<3x128xf32, #tpu.memory_space<vmem>>, %arg4: memref<8x128xf32, #tpu.memory_space<vmem>>) attributes {dimension_semantics = [#tpu.dimension_semantics<parallel>], iteration_bounds = array<i64: 2>, scalar_prefetch = 0 : i64, scratch_operands = 0 : i64, tpu.core_type = #tpu.core_type<tc>, window_params = [{transform_indices = @transform_0, window_bounds = array<i64: 8, 16>}, {pipeline_mode = #tpu.pipeline_mode<synchronous>, transform_indices = @transform_1, window_bounds = array<i64: 16, 128>}, {pipeline_mode = #tpu.pipeline_mode<synchronous>, transform_indices = @transform_2, window_bounds = array<i64: 3, 128>}, {transform_indices = @transform_3, window_bounds = array<i64: 8, 128>}]} {
    %c0 = arith.constant 0 : index
    %c0_0 = arith.constant 0 : index
    %0 = vector.load %arg1[%c0, %c0_0] : memref<8x16xf32, #tpu.memory_space<vmem>>, vector<8x16xf32>
    %c0_1 = arith.constant 0 : index
    %c0_2 = arith.constant 0 : index
    %1 = vector.load %arg2[%c0_1, %c0_2] : memref<16x128xf32, #tpu.memory_space<vmem>>, vector<16x128xf32>
    %cst = arith.constant dense<0.000000e+00> : vector<8x128xf32>
    %2 = tpu.matmul %0, %1, %cst {dimension_numbers = #tpu.dot_dimension_numbers<[1], [0], [0], [1], [0, 0, 1, 1], [], []>} : vector<8x16xf32>, vector<16x128xf32>, vector<8x128xf32> -> vector<8x128xf32>
    %c0_3 = arith.constant 0 : index
    %c0_4 = arith.constant 0 : index
    %3 = vector.load %arg3[%c0_3, %c0_4] : memref<3x128xf32, #tpu.memory_space<vmem>>, vector<1x128xf32>
    %4 = vector.broadcast %3 : vector<1x128xf32> to vector<8x128xf32>
    %5 = arith.addf %2, %4 : vector<8x128xf32>
    %cst_5 = arith.constant 5.000000e-01 : f32
    %6 = vector.broadcast %cst_5 : f32 to vector<8x128xf32>
    %7 = arith.mulf %6, %5 : vector<8x128xf32>
    %cst_6 = arith.constant 0.707106769 : f32
    %8 = vector.broadcast %cst_6 : f32 to vector<8x128xf32>
    %9 = arith.mulf %5, %8 : vector<8x128xf32>
    %10 = math.erf %9 : vector<8x128xf32>
    %cst_7 = arith.constant 1.000000e+00 : f32
    %11 = vector.broadcast %cst_7 : f32 to vector<8x128xf32>
    %12 = arith.addf %11, %10 : vector<8x128xf32>
    %13 = arith.mulf %7, %12 : vector<8x128xf32>
    %cst_8 = arith.constant dense<0.000000e+00> : vector<8xf32>
    %14 = vector.multi_reduction <add>, %13, %cst_8 [1] : vector<8x128xf32> to vector<8xf32>
    %15 = vector.shape_cast %14 : vector<8xf32> to vector<8x1xf32>
    %cst_9 = arith.constant 1.280000e+02 : f32
    %16 = vector.broadcast %cst_9 : f32 to vector<8x1xf32>
    %17 = arith.divf %15, %16 : vector<8x1xf32>
    %18 = vector.broadcast %17 : vector<8x1xf32> to vector<8x128xf32>
    %19 = arith.subf %13, %18 : vector<8x128xf32>
    %20 = arith.mulf %19, %19 : vector<8x128xf32>
    %cst_10 = arith.constant dense<0.000000e+00> : vector<8xf32>
    %21 = vector.multi_reduction <add>, %20, %cst_10 [1] : vector<8x128xf32> to vector<8xf32>
    %22 = vector.shape_cast %21 : vector<8xf32> to vector<8x1xf32>
    %cst_11 = arith.constant 1.280000e+02 : f32
    %23 = vector.broadcast %cst_11 : f32 to vector<8x1xf32>
    %24 = arith.divf %22, %23 : vector<8x1xf32>
    %cst_12 = arith.constant 9.99999996E-13 : f32
    %25 = vector.broadcast %cst_12 : f32 to vector<8x1xf32>
    %26 = arith.addf %24, %25 : vector<8x1xf32>
    %27 = math.rsqrt %26 : vector<8x1xf32>
    %28 = vector.broadcast %27 : vector<8x1xf32> to vector<8x128xf32>
    %29 = arith.mulf %19, %28 : vector<8x128xf32>
    %c1 = arith.constant 1 : index
    %c0_13 = arith.constant 0 : index
    %30 = vector.load %arg3[%c1, %c0_13] : memref<3x128xf32, #tpu.memory_space<vmem>>, vector<1x128xf32>
    %31 = vector.broadcast %30 : vector<1x128xf32> to vector<8x128xf32>
    %32 = arith.mulf %29, %31 : vector<8x128xf32>
    %c2 = arith.constant 2 : index
    %c0_14 = arith.constant 0 : index
    %33 = vector.load %arg3[%c2, %c0_14] : memref<3x128xf32, #tpu.memory_space<vmem>>, vector<1x128xf32>
    %34 = vector.broadcast %33 : vector<1x128xf32> to vector<8x128xf32>
    %35 = arith.addf %32, %34 : vector<8x128xf32>
    %c0_15 = arith.constant 0 : index
    %c0_16 = arith.constant 0 : index
    %36 = vector.load %arg4[%c0_15, %c0_16] : memref<8x128xf32, #tpu.memory_space<vmem>>, vector<8x128xf32>
    tpu.vector_store %arg4[%c0_15, %c0_16], %35 {strides = array<i32>} : memref<8x128xf32, #tpu.memory_space<vmem>>, vector<8x128xf32>,
    return
  }
  func.func @transform_0(%arg0: i32) -> (i32, i32) {
    %c0_i32 = arith.constant 0 : i32
    %c0_i32_0 = arith.constant 0 : i32
    return %arg0, %c0_i32 : i32, i32
  }
  func.func @transform_1(%arg0: i32) -> (i32, i32) {
    %c0_i32 = arith.constant 0 : i32
    %c0_i32_0 = arith.constant 0 : i32
    %c0_i32_1 = arith.constant 0 : i32
    return %c0_i32, %c0_i32_0 : i32, i32
  }
  func.func @transform_2(%arg0: i32) -> (i32, i32) {
    %c0_i32 = arith.constant 0 : i32
    %c0_i32_0 = arith.constant 0 : i32
    %c0_i32_1 = arith.constant 0 : i32
    return %c0_i32, %c0_i32_0 : i32, i32
  }
  func.func @transform_3(%arg0: i32) -> (i32, i32) {
    %c0_i32 = arith.constant 0 : i32
    %c0_i32_0 = arith.constant 0 : i32
    return %arg0, %c0_i32 : i32, i32
  }
}

</mosaic_0001>

<bundles_post_ra>
// kernel: tpu_custom_call.1
= control target key start
LH: loop header
LB: loop body
LE: loop exit
PB: predicated region body
PF: predicated region fallthrough
CT: control target
= control target key end

     0   :  { %8 = vsyncpa [#allocation3], 0  ;;  %s871_s0 = inlined_call_operand.hbm [shape: f32[16,16], index: 0, kind: input, shape index: {}]   ;;  %s872_s1 = inlined_call_operand.hbm [shape: f32[16,128], index: 1, kind: input, shape index: {}]   ;;  %s873_s2 = inlined_call_operand.vmem [shape: f32[3,128], index: 2, kind: input, shape index: {}]   ;;  %s874_s3 = inlined_call_operand.hbm [shape: f32[16,128], index: 3, kind: output, shape index: {}]  }
   0x1   :  { %10 = vsyncpa [#allocation3 + $0x1], 0 }
   0x2   :  { %11 = vsyncpa [#allocation6], 0 }
   0x3   :  { %12 = vsyncpa [#allocation4], 0 }
   0x4   :  { %14 = vsyncpa [#allocation4 + $0x1], 0  ;;  %s662_s12 = smov 0   ;;  %s664_s13 = smov 0  }
   0x5   :  { %s666_s14 = smov 0   ;;  %s668_s15 = smov 0  }
   0x6 LB: > { %s683_s16 = sadd.s32 4294967295, %s632_s15   ;;  %s407_s17 = sadd.s32 4294967294, %s632_s15   ;;  %s632_s15 = sphi %s668_s15, %s894_s15   ;;  %s628_s14 = sphi %s666_s14, %s893_s14   ;;  %s624_s13 = sphi %s664_s13, %s892_s13   ;;  %s620_s12 = sphi %s662_s12, %s891_s12  }
   0x7   : > { %p40_p0 = scmp.ne.s32.totalorder %s624_s13, %s620_s12  ;;  %p875_p1 = scmp.eq.s32.totalorder %s683_s16, 0 }
   0x8   : > { %p112_p3 = scmp.eq.s32.totalorder %s407_s17, 1  ;;  %p408_p5 = scmp.ge.s32.totalorder %s632_s15, 1 }
   0x9   : > { %p692_p4 = por %p875_p1, %p40_p0  ;;  %p119_p7 = scmp.lt.s32.totalorder %s632_s15, 3 }
   0xa   : > { %p697_p6 = por %p112_p3, %p40_p0  ;;  %s634_s21 = smov [#allocation5]  }
   0xb   : > { %s878_s18 = scalar_select %p692_p4, 1, 0 }
   0xc   : > { %s879_s19 = scalar_select %p697_p6, 1, 0 }
   0xd   : > { %p702_p8 = pnand %p408_p5, %p119_p7  ;;  %s131_s22 = sshll.u32 %s634_s21, 4  ;;  %s706_s22 = int_to_ptr.vmem [resolvable:$true] %s131_s22 }
   0xe   : > { %s718_s24 = sadd.s32 1, %s632_s15   ;;  %s27_s25 = sadd.s32 1, %s628_s14 }
   0xf   : > { %s880_s20 = scalar_select %p702_p8, 1, 0 }
  0x10   : > { %p446_p9 = pneg %p702_p8  ;;  %s24_s26 = ssub.s32 %s632_s15, %s718_s24 }
  0x11   : > { %s504_s29 = scalar_lea.hbm %s872_s1, 256 }
  0x12   : > { %p713_p11 = pnand %p446_p9, %p875_p1  ;;  %p505_p12 = scmp.ne.s32.totalorder %s872_s1, %s504_s29 }
  0x13   : > { %p511_p5 = scmp.lt.u32.totalorder %s504_s29, %s872_s1 }
  0x14   : > { %p506_p13 = pneg %p713_p11 }
  0x16   : > { %p507_p0 = pnand %p506_p13, %p505_p12 }
  0x18   : > { %p508_p3 = pneg %p507_p0 }
  0x1a   : > { %p513_p7 = pnand %p511_p5, %p508_p3 }
  0x1c   : > { %516 = shalt.err (!%p513_p7)
}
  0x1d   : > { %s517_s7 = scalar_lea.vmem %s706_s22, 256  ;;  %p525_p2 = scmp.lt.s32.totalorder %s706_s22, %s706_s22 }
  0x1e   : > { %p518_p9 = scmp.ne.s32.totalorder %s706_s22, %s517_s7  ;;  %p526_p6 = scmp.lt.s32.totalorder %s517_s7, %s517_s7 }
  0x20   : > { %p520_p10 = pnand %p518_p9, %p506_p13  ;;  %p527_p4 = por %p526_p6, %p525_p2 }
  0x22   : > { %p521_p1 = pneg %p520_p10 }
  0x24   : > { %p528_p8 = pnand %p527_p4, %p521_p1 }
  0x26   : > { %531 = shalt.err (!%p528_p8)
}
  0x27   : > { %s635_s8 = smov 128   ;;  %s636_s9 = smov 8  }
  0x28   : > { %449 = dma.hbm_to_vmem [thread:$0]  (!%p713_p11), %s872_s1, 256, %s706_s22, [#allocation6], %s635_s8, %s635_s8, %s636_s9  }
  0x29   : > { %p25_p2 = scmp.eq.s32.totalorder %s24_s26, 0  ;;  %p34_p1 = scmp.ne.s32.totalorder %s628_s14, %s624_s13 }
  0x2a   : > { %p35_p4 = scmp.eq.s32.totalorder %s632_s15, 0  ;;  %p459_p6 = scmp.lt.s32.totalorder %s632_s15, 2 }
  0x2b   : > { %s749_s17 = scalar_select %p25_p2, %s628_s14, %s27_s25  }
  0x2c   : > { %p36_p8 = por %p35_p4, %p34_p1  ;;  %p882_p10 = scmp.eq.s32.totalorder %s683_s16, 1 }
  0x2d   : > { %s148_s27 = sand.u32 1, %s628_s14   ;;  %s412_s28 = sshll.u32 %s632_s15, 7 }
  0x2e   : > { %p753_p12 = por %p882_p10, %p34_p1  ;;  %s411_s29 = sshll.u32 %s148_s27, 3 }
  0x2f   : > { %s762_s4 = scalar_lea.hbm %s871_s0, %s412_s28  ;;  %s152_s22 = scalar_lea.vmem [#allocation2], %s411_s29 }
  0x30   : > { %s159_s25 = sshll.u32 %s152_s22, 4  ;;  %p764_p11 = pnand %p459_p6, %p36_p8  ;;  %s768_s25 = int_to_ptr.vmem [resolvable:$true] %s159_s25 }
  0x31   : > { %s149_s5 = scalar_lea.sflag [#allocation3], %s148_s27  ;;  %s532_s6 = scalar_lea.hbm %s762_s4, 128 }
  0x32   : > { %p533_p13 = scmp.ne.s32.totalorder %s762_s4, %s532_s6  ;;  %p534_p0 = pneg %p764_p11 }
  0x33   : > { %s537_s9 = scalar_lea.hbm %s871_s0, 256  ;;  %p538_p7 = scmp.lt.u32.totalorder %s762_s4, %s871_s0 }
  0x34   : > { %p535_p3 = pnand %p534_p0, %p533_p13  ;;  %p539_p9 = scmp.lt.u32.totalorder %s537_s9, %s532_s6 }
  0x35   : > { %p541_p1 = scmp.lt.u32.totalorder %s532_s6, %s762_s4 }
  0x36   : > { %p536_p5 = pneg %p535_p3  ;;  %p540_p2 = por %p539_p9, %p538_p7 }
  0x38   : > { %p542_p4 = por %p541_p1, %p540_p2 }
  0x3a   : > { %p543_p6 = pnand %p542_p4, %p536_p5 }
  0x3c   : > { %546 = shalt.err (!%p543_p6)
}
  0x3d   : > { %s547_s27 = scalar_lea.vmem %s768_s25, 128  ;;  %s637_s28 = smov [#allocation2]  }
  0x3e   : > { %p548_p8 = scmp.ne.s32.totalorder %s768_s25, %s547_s27  ;;  %s552_s29 = sshll.u32 %s637_s28, 4  ;;  %s553_s29 = int_to_ptr.vmem [resolvable:$false] %s552_s29 }
  0x3f   : > { %s554_s23 = scalar_lea.vmem %s553_s29, 256  ;;  %p555_p3 = scmp.lt.s32.totalorder %s768_s25, %s553_s29 }
  0x40   : > { %p550_p10 = pnand %p548_p8, %p534_p0  ;;  %p556_p7 = scmp.lt.s32.totalorder %s554_s23, %s547_s27 }
  0x42   : > { %p551_p13 = pneg %p550_p10  ;;  %p557_p9 = por %p556_p7, %p555_p3 }
  0x44   : > { %p558_p2 = pnand %p557_p9, %p551_p13 }
  0x46   : > { %561 = shalt.err (!%p558_p2)
}
  0x47   : > { %453 = dma.hbm_to_vmem [thread:$0]  (!%p764_p11), %s762_s4, 128, %s768_s25, %s149_s5  }
  0x48   : > { %p885_p5 = scmp.ne.s32.totalorder %s880_s20, 0 }
  0x49   : > { %s798_s30 = sand.u32 (!%p885_p5), 1, %s624_s13   ;;  %p886_p0 = scmp.ne.s32.totalorder (!%p885_p5), %s878_s18, 0 }
  0x4a   : > { %168 = sbr.rel (%p885_p5) target bundleno = 647 (0x287), region = 32  ;;  %s414_s22 = sshll.u32 (!%p885_p5), %s798_s30, 3 }
  0x4b   : > { %s171_s6 = scalar_lea.sflag (!%p885_p5), [#allocation3], %s798_s30  ;;  %s174_s7 = scalar_lea.vmem (!%p885_p5), [#allocation2], %s414_s22 }
  0x51   : > { %607 = dma.done.wait (%p886_p0), %s171_s6, 128  }
  0x52   : > { %609 = vsyncadd (%p886_p0), %s171_s6, 4294967168  ;;  %p887_p11 = scmp.eq.s32.totalorder %s683_s16, 0 }
  0x54   : > { %611 = dma.done.wait (%p887_p11), [#allocation6], 256   ;;  %p888_p1 = pmov %p887_p11 }
  0x55   : > { %v638_v0 = vmov 0.0|0.0   ;;  %vm639_vm0 = vmmov 0   ;;  %v640_v1 = vmov 0.0   ;;  %v202_v2 = vld [vmem:[#allocation5] sm:$0xff]  ;;  %v203_v3 = vld [vmem:[#allocation5 + $0x8] sm:$0xff]  ;;  %v201_v5 = vld [vmem:[%s174_s7] sm:$0xff] }
  0x56   : > { %613 = vsyncadd (%p888_p1), [#allocation6], 4294967040  ;;  %435 = vmatprep.subr.bf16.mxu0 %v638_v0  ;;  %432 = vmatprep.mubr.msk.f32.mxu0 %vm639_vm0, %v640_v1  ;;  %v436_v4 = vpack.c.bf16 %v203_v3, %v202_v2  ;;  %vm209_vm1 = vcmask 130048   ;;  %v417_v6 = vld [vmem:[%s873_s2] ss:$0 sm:$0xff]  ;;  %s422_s8 = sshll.u32 %s683_s16, 7 }
  0x57   : > { %v419_v23 = vld [vmem:[%s873_s2 + $0x1] ss:$0 sm:$0xff]  ;;  %v420_v25 = vld [vmem:[%s873_s2 + $0x2] ss:$0 sm:$0xff]  ;;  %s200_s9 = scalar_lea.vmem [#allocation7], %s414_s22  ;;  %s827_s28 = scalar_lea.hbm %s874_s3, %s422_s8 }
  0x58   : > { %437 = vmatpush3.bf16.msra.mxu0 %v436_v4  ;;  %s327_s10 = sshll.u32 %s200_s9, 4  ;;  %s314_s29 = scalar_lea.sflag [#allocation4], %s798_s30  ;;  %s829_s10 = int_to_ptr.vmem [resolvable:$true] %s327_s10 }
  0x59   : > { %s562_s23 = scalar_lea.vmem %s829_s10, 128  ;;  %s641_s16 = smov [#allocation7]  }
  0x5a   : > { %p563_p4 = scmp.ne.s32.totalorder %s829_s10, %s562_s23  ;;  %s566_s22 = sshll.u32 %s641_s16, 4  ;;  %s567_s22 = int_to_ptr.vmem [resolvable:$false] %s566_s22 }
  0x5b   : > { %433 = vmatmul.mubr.msk.f32.vlgmr.msra.gmra.mrb[0].mxu0 %vm209_vm1, %v201_v5  ;;  %s568_s6 = scalar_lea.vmem %s567_s22, 256  ;;  %p569_p10 = scmp.lt.s32.totalorder %s829_s10, %s567_s22 }
  0x5c   : > { %p564_p6 = pnand %p563_p4, %p753_p12  ;;  %p570_p13 = scmp.lt.s32.totalorder %s568_s6, %s562_s23 }
  0x5e   : > { %p565_p8 = pneg %p564_p6  ;;  %p571_p3 = por %p570_p13, %p569_p10 }
  0x60   : > { %p572_p7 = pnand %p571_p3, %p565_p8 }
 0x12e   : > { %v279_v7 = vpop.f32.mrb[0].mxu0 }
 0x12f   : > { %v280_v8 = vadd.f32 %v417_v6, %v279_v7  ;;  %v434_v9 = vpop.f32.mrb[1].mxu0 }
 0x131   : > { %v284_v10 = vmul.f32 0.70710677, %v280_v8  ;;  %v283_v12 = vmul.f32 0.5, %v280_v8 }
 0x133   : > { %500 = verf.f32 %v284_v10 }
 0x13d   : > { %v501_v11 = vpop.eup %500 }
 0x13e   : > { %v286_v13 = vadd.f32 1.0, %v501_v11 }
 0x140   : > { %v287_v14 = vmul.f32 %v286_v13, %v283_v12 }
 0x142   : > { %288 = vadd.xlane.f32.xlu0 %v287_v14 }
 0x1cf   : > { %v289_v15 = vpop.xlane.xlu0 %288 }
 0x1d0   : > { %v291_v16 = vmul.f32 0.0078125, %v289_v15 }
 0x1d2   : > { %v292_v17 = vsub.f32 %v287_v14, %v291_v16 }
 0x1d4   : > { %v293_v18 = vmul.f32 %v292_v17, %v292_v17 }
 0x1d6   : > { %294 = vadd.xlane.f32.xlu0 %v293_v18 }
 0x263   : > { %v295_v19 = vpop.xlane.xlu0 %294 }
 0x264   : > { %v296_v20 = vmul.f32 0.0078125, %v295_v19 }
 0x266   : > { %v297_v21 = vadd.f32 1e-12, %v296_v20 }
 0x268   : > { %502 = vrsqrt.f32 %v297_v21 }
 0x272   : > { %v503_v22 = vpop.eup %502 }
 0x273   : > { %v299_v24 = vmul.f32 %v503_v22, %v292_v17 }
 0x275   : > { %v305_v26 = vmul.f32 %v419_v23, %v299_v24 }
 0x277   : > { %v311_v27 = vadd.f32 %v420_v25, %v305_v26 }
 0x279   : > { %312 = vst [vmem:[%s200_s9] sm:$0xff] %v311_v27 }
 0x27a   : > { %575 = shalt.err (!%p572_p7)
}
 0x27b   : > { %s576_s30 = scalar_lea.hbm %s827_s28, 128  ;;  %s580_s20 = scalar_lea.hbm %s874_s3, 256 }
 0x27c   : > { %p577_p9 = scmp.ne.s32.totalorder %s827_s28, %s576_s30  ;;  %p581_p0 = scmp.lt.u32.totalorder %s827_s28, %s874_s3 }
 0x27d   : > { %p582_p11 = scmp.lt.u32.totalorder %s580_s20, %s576_s30  ;;  %p584_p4 = scmp.lt.u32.totalorder %s576_s30, %s827_s28 }
 0x27e   : > { %p578_p2 = pnand %p577_p9, %p753_p12 }
 0x27f   : > { %p583_p1 = por %p582_p11, %p581_p0 }
 0x280   : > { %p579_p5 = pneg %p578_p2 }
 0x281   : > { %p585_p6 = por %p584_p4, %p583_p1 }
 0x283   : > { %p586_p8 = pnand %p585_p6, %p579_p5 }
 0x285   : > { %589 = shalt.err (!%p586_p8)
}
 0x286   : > { %444 = dma.vmem_to_hbm [thread:$0]  (%p753_p12), %s829_s10, 128, %s827_s28, %s314_s29  }
 0x287 PF: > { %s339_s26 = sand.u32 1, %s620_s12   ;;  %p889_p10 = scmp.ne.s32.totalorder %s879_s19, 0 }
 0x288   : > { %p890_p13 = scmp.ge.s32.totalorder %s632_s15, 2  ;;  %s340_s5 = scalar_lea.sflag [#allocation4], %s339_s26 }
 0x28a   : > { %p455_p3 = pnand %p890_p13, %p889_p10 }
 0x28c   : > { %615 = dma.done.wait (!%p455_p3), %s340_s5, 128  }
 0x28d   : > { %617 = vsyncadd (!%p455_p3), %s340_s5, 4294967168  ;;  %p17_p7 = scmp.ge.s32.totalorder %s718_s24, 4   ;;  %s891_s12 = smov %s624_s13 }
 0x28e   : > { %s892_s13 = smov %s628_s14  ;;  %s893_s14 = smov %s749_s17 }
 0x28f   : > { %s894_s15 = smov %s718_s24  ;;  %19 = sbr.rel (!%p17_p7) target bundleno = 6 (0x6), region = 81 }
 0x296   :  { %345 = vsyncpa [#allocation3], 1 }
 0x297   :  { %347 = vsyncpa [#allocation3 + $0x1], 1 }
 0x298   :  { %348 = vsyncpa [#allocation6], 1 }
 0x299   :  { %349 = vsyncpa [#allocation4], 1 }
 0x29a   :  { %351 = vsyncpa [#allocation4 + $0x1], 1 }

</bundles_post_ra>
